<compile_context>
chip_gen: v7x
topology: tpu7x:2x2x1
jax: 0.10.0
libtpu: 0.0.40
codegen_flags: <defaults>
</compile_context>

<pallas_src>
import jax
import jax.numpy as jnp
from jax.experimental import pallas as pl
from jax.experimental.pallas import tpu as pltpu

# ----------------------------- model config ---------------------------------
USER_VOCAB = 100
ITEM_VOCAB = 50
EMB_DIM = 16                     # embedding_dim
USER_FEAT = 8                    # input_user_feature_size
ITEM_FEAT = 8                    # input_item_feature_size
DENSE = USER_FEAT + ITEM_FEAT
F_IN = 2 * EMB_DIM + DENSE       # Cross in_features / MLP input_size = 48
HIDDEN = 2 * EMB_DIM             # MLP hidden_size = 32
MLP_OUT = EMB_DIM                # MLP output_size = 16
F_PAD = F_IN + HIDDEN            # fused-column width = 80
CROSS_LAYERS = 2
BATCH = 8

# TODO(synk): the reference `MLP` class is not given; assumed structure is
# `hidden_layers` (=3) Linear+ReLU hidden layers followed by a final Linear.


def _round_up(x, m):
    return (x + m - 1) // m * m


# ------------------------------- kernel --------------------------------------
def _dcnv2_kernel(ids_ref,        # (TB, N_ids) int32: user ids ++ (item ids + USER_VOCAB)
                  dense_ref,      # (TB, F_PAD) f32: zeros | user_feat | item_feat | zeros
                  emb_ref,        # (150, F_PAD) bf16 block-diag stacked embedding table
                  rhs1_ref,       # (F_PAD, F_PAD) bf16: rows 0:48 = [K0^T | W1], rest 0
                  bias1_ref,      # (1, F_PAD) f32: [cross_bias0 | b1]
                  rhs2_ref,       # (F_PAD, F_PAD) bf16: blockdiag(K1^T, W2)
                  bias2_ref,      # (1, F_PAD) f32: [cross_bias1 | b2]
                  w3_ref,         # (F_PAD, HIDDEN) bf16: rows 48:80 = W3, rest 0
                  b3_ref,         # (1, HIDDEN) f32
                  w4_ref,         # (HIDDEN, MLP_OUT) bf16
                  b4_ref,         # (1, MLP_OUT) f32
                  twc_ref,        # (1, F_PAD) f32: `together` weight, cross part (padded)
                  twd_ref,        # (1, MLP_OUT) f32: `together` weight, deep part
                  out_ref):       # (TB, 1) f32
    tb = ids_ref.shape[0]
    n_ids = ids_ref.shape[1]
    vocab = emb_ref.shape[0]

    # ---- embedding gather + multi-id sum as ONE multi-hot matmul ----
    # multi_hot[b, v] = #(slots s with ids[b, s] == v); built directly in bf16
    # (counts 0..n_ids are exact).  emb_ref is block-diagonal, so one matmul
    # yields [u_emb | i_emb | 0 ...] in the 80-lane slab.
    iota = jax.lax.broadcasted_iota(jnp.int32, (tb, vocab), 1)
    mh = jnp.zeros((tb, vocab), jnp.bfloat16)
    for s in range(n_ids):                              # small, unrolled
        mh = mh + (iota == ids_ref[:, s:s + 1]).astype(jnp.bfloat16)

    # combined x0 (padded to 80 lanes, lanes 48:80 are zero):
    #   [u_emb | i_emb | user_feat | item_feat | 0 ... 0]
    x0e = jnp.dot(mh, emb_ref[...], preferred_element_type=jnp.float32) \
        + dense_ref[...]                                 # (tb, F_PAD) f32
    x0e_b = x0e.astype(jnp.bfloat16)

    lane = jax.lax.broadcasted_iota(jnp.int32, (tb, F_PAD), 1)
    cross_mask = lane < F_IN                             # lanes 0:48 = cross half

    # ---- fused matmul 1: cross layer 0 (cols 0:48) + MLP layer 1 (cols 48:80) ----
    # rhs1 rows 48:80 are zero, so the zero-padded lanes of x0e contribute nothing.
    y1 = jnp.dot(x0e_b, rhs1_ref[...],
                 preferred_element_type=jnp.float32) + bias1_ref[...]
    x1e = x0e * y1 + x0e                                 # x1 in lanes 0:48, 0 elsewhere
    # LHS for fusion 2: [x1 | relu(h1_pre)] assembled with a lane-mask select (VPU only).
    lhs2 = jnp.where(cross_mask, x1e, jnp.maximum(y1, 0.0))

    # ---- fused matmul 2: cross layer 1 + MLP layer 2 (block-diagonal RHS) ----
    y2 = jnp.dot(lhs2.astype(jnp.bfloat16), rhs2_ref[...],
                 preferred_element_type=jnp.float32) + bias2_ref[...]
    x2e = x0e * y2 + x1e                                 # cross output, 0 beyond lane 48
    # ReLU of the MLP half; lanes 0:48 hit zero rows of the padded W3 -> no mask needed.
    h2e = jnp.maximum(y2, 0.0)

    # ---- remaining MLP: layer 3 (+ReLU) and output layer ----
    h3 = jnp.maximum(
        jnp.dot(h2e.astype(jnp.bfloat16), w3_ref[...],
                preferred_element_type=jnp.float32) + b3_ref[...], 0.0)
    deep = jnp.dot(h3.astype(jnp.bfloat16), w4_ref[...],
                   preferred_element_type=jnp.float32) + b4_ref[...]

    # ---- together (Linear(F_IN + MLP_OUT -> 1, no bias)): VPU mul + lane reduce ----
    # concat([cross, deep]) @ W == sum(cross * Wc) + sum(deep * Wd)
    logit = (jnp.sum(x2e * twc_ref[...], axis=-1, keepdims=True) +
             jnp.sum(deep * twd_ref[...], axis=-1, keepdims=True))   # (tb, 1)

    out_ref[...] = jax.nn.sigmoid(logit)


# ------------------------------ parameters -----------------------------------
def init_raw_params(key):
    """Raw f32 parameters matching the PyTorch module layout/initialization."""
    ks = jax.random.split(key, 8)
    user_tbl = jax.random.normal(ks[0], (USER_VOCAB, EMB_DIM), jnp.float32)
    item_tbl = jax.random.normal(ks[1], (ITEM_VOCAB, EMB_DIM), jnp.float32)
    # Cross: xavier_normal kernels (L, F, F), zero biases.
    xav_std = (2.0 / (F_IN + F_IN)) ** 0.5
    ck = xav_std * jax.random.normal(ks[2], (CROSS_LAYERS, F_IN, F_IN), jnp.float32)
    cb = jnp.zeros((CROSS_LAYERS, 1, F_IN), jnp.float32)

    def lin(k, fan_in, fan_out):                         # PyTorch Linear init
        bound = (1.0 / fan_in) ** 0.5
        kw, kb = jax.random.split(k)
        w = jax.random.uniform(kw, (fan_in, fan_out), jnp.float32, -bound, bound)
        b = jax.random.uniform(kb, (1, fan_out), jnp.float32, -bound, bound)
        return w, b
    w1, b1 = lin(ks[3], F_IN, HIDDEN)
    w2, b2 = lin(ks[4], HIDDEN, HIDDEN)
    w3, b3 = lin(ks[5], HIDDEN, HIDDEN)
    w4, b4 = lin(ks[6], HIDDEN, MLP_OUT)
    bound = (1.0 / (F_IN + MLP_OUT)) ** 0.5
    tw = jax.random.uniform(ks[7], (1, F_IN + MLP_OUT), jnp.float32, -bound, bound)
    return dict(user_tbl=user_tbl, item_tbl=item_tbl, ck=ck, cb=cb,
                w1=w1, b1=b1, w2=w2, b2=b2, w3=w3, b3=b3, w4=w4, b4=b4, tw=tw)


def pack_params(raw):
    """Pre-fuse / pre-pad the raw parameters into the kernel's matmul operands."""
    bf16 = jnp.bfloat16
    ck_t = jnp.swapaxes(raw["ck"], 1, 2)                 # store K^T: x @ K^T == (K @ x)^T

    # Block-diagonal stacked embedding table, output padded to F_PAD lanes.
    emb_tbl = jnp.zeros((USER_VOCAB + ITEM_VOCAB, F_PAD), jnp.float32)
    emb_tbl = emb_tbl.at[:USER_VOCAB, :EMB_DIM].set(raw["user_tbl"])
    emb_tbl = emb_tbl.at[USER_VOCAB:, EMB_DIM:2 * EMB_DIM].set(raw["item_tbl"])

    # Fused RHS 1: rows 0:48 = [K0^T | W1]; rows 48:80 zero (hit by x0's zero pad).
    rhs1 = jnp.zeros((F_PAD, F_PAD), jnp.float32)
    rhs1 = rhs1.at[:F_IN, :F_IN].set(ck_t[0])
    rhs1 = rhs1.at[:F_IN, F_IN:].set(raw["w1"])
    bias1 = jnp.concatenate([raw["cb"][0], raw["b1"]], axis=1)       # (1, 80)

    # Fused RHS 2: blockdiag(K1^T, W2).
    rhs2 = jnp.zeros((F_PAD, F_PAD), jnp.float32)
    rhs2 = rhs2.at[:F_IN, :F_IN].set(ck_t[1])
    rhs2 = rhs2.at[F_IN:, F_IN:].set(raw["w2"])
    bias2 = jnp.concatenate([raw["cb"][1], raw["b2"]], axis=1)       # (1, 80)

    # W3 padded so the full 80-lane (ReLU'd) y2 can be its LHS without slicing.
    w3p = jnp.zeros((F_PAD, HIDDEN), jnp.float32).at[F_IN:, :].set(raw["w3"])

    # `together` weight split: padded cross part + deep part.
    twc = jnp.zeros((1, F_PAD), jnp.float32).at[:, :F_IN].set(raw["tw"][:, :F_IN])
    twd = raw["tw"][:, F_IN:]

    return dict(emb_tbl=emb_tbl.astype(bf16),
                rhs1=rhs1.astype(bf16), bias1=bias1,
                rhs2=rhs2.astype(bf16), bias2=bias2,
                w3=w3p.astype(bf16), b3=raw["b3"],
                w4=raw["w4"].astype(bf16), b4=raw["b4"],
                twc=twc, twd=twd)


# ------------------------------ full forward ----------------------------------
@jax.jit
def dcnv2_forward(params, user_ids, item_ids, user_features, item_features):
    # normalize id ranks independently (1-D -> single-id column)
    if user_ids.ndim == 1:
        user_ids = user_ids[:, None]
    if item_ids.ndim == 1:
        item_ids = item_ids[:, None]
    b = user_ids.shape[0]

    # Merge ids into one int32 array over the stacked vocab; merge dense features
    # into one 80-lane slab already placed at lanes 32:48 (fewer, larger DMAs and
    # no in-kernel assembly of `combined`).
    ids = jnp.concatenate([user_ids.astype(jnp.int32),
                           item_ids.astype(jnp.int32) + USER_VOCAB], axis=1)
    dense = jnp.concatenate(
        [jnp.zeros((b, 2 * EMB_DIM), jnp.float32),
         user_features.astype(jnp.float32),
         item_features.astype(jnp.float32),
         jnp.zeros((b, HIDDEN), jnp.float32)], axis=1)           # (b, F_PAD)

    # Batch tile: large (<=512 rows) to amortize per-step overhead, but keep the
    # grid >= 2 for batches > 8 so the "parallel" axis shards across v7x's 2 TCs.
    b8 = _round_up(b, 8)
    if b8 <= 8:
        tb = b8
    else:
        tb = min(512, _round_up((b8 + 1) // 2, 8))
    b_pad = _round_up(b8, tb)
    pad = b_pad - b
    if pad:
        ids = jnp.pad(ids, ((0, pad), (0, 0)))
        dense = jnp.pad(dense, ((0, pad), (0, 0)))

    n_ids = ids.shape[1]

    def batch_tile(width):
        return pl.BlockSpec((tb, width), lambda i: (i, 0))

    def resident(arr):
        # Constant index map -> fetched once, stays VMEM-resident across the grid.
        return pl.BlockSpec(arr.shape, lambda i: (0, 0))

    p = params
    weights = (p["emb_tbl"], p["rhs1"], p["bias1"], p["rhs2"], p["bias2"],
               p["w3"], p["b3"], p["w4"], p["b4"], p["twc"], p["twd"])

    out = pl.pallas_call(
        _dcnv2_kernel,
        out_shape=jax.ShapeDtypeStruct((b_pad, 1), jnp.float32),
        grid=(b_pad // tb,),
        in_specs=[batch_tile(n_ids), batch_tile(F_PAD)]
                 + [resident(w) for w in weights],
        out_specs=pl.BlockSpec((tb, 1), lambda i: (i, 0)),
        compiler_params=pltpu.CompilerParams(
            dimension_semantics=("parallel",)),
    )(ids, dense, *weights)

    return out[:b]


# ------------------------- pure-JAX f32 reference ----------------------------
def dcnv2_reference(raw, user_ids, item_ids, user_features, item_features):
    if user_ids.ndim == 1:
        user_ids = user_ids[:, None]
    if item_ids.ndim == 1:
        item_ids = item_ids[:, None]
    u_emb = raw["user_tbl"][user_ids].sum(axis=-2)
    i_emb = raw["item_tbl"][item_ids].sum(axis=-2)
    comb = jnp.concatenate([u_emb, i_emb,
                            user_features.astype(jnp.float32),
                            item_features.astype(jnp.float32)], axis=-1)
    x0 = comb
    xl = comb
    for i in range(CROSS_LAYERS):
        xl = x0 * (xl @ raw["ck"][i].T + raw["cb"][i]) + xl
    h = jnp.maximum(comb @ raw["w1"] + raw["b1"], 0.0)
    h = jnp.maximum(h @ raw["w2"] + raw["b2"], 0.0)
    h = jnp.maximum(h @ raw["w3"] + raw["b3"], 0.0)
    deep = h @ raw["w4"] + raw["b4"]
    logit = jnp.concatenate([xl, deep], axis=-1) @ raw["tw"].T
    return jax.nn.sigmoid(logit)


if __name__ == "__main__":
    key = jax.random.PRNGKey(0)
    pkey, k1, k2, k3, k4 = jax.random.split(key, 5)
    raw = init_raw_params(pkey)
    params = pack_params(raw)

    # multi-id inputs (exercise the sum-over-ids path), dense features
    user_ids = jax.random.randint(k1, (BATCH, 3), 0, USER_VOCAB)
    item_ids = jax.random.randint(k2, (BATCH, 3), 0, ITEM_VOCAB)
    user_features = jax.random.normal(k3, (BATCH, USER_FEAT), jnp.float32)
    item_features = jax.random.normal(k4, (BATCH, ITEM_FEAT), jnp.float32)

    out = dcnv2_forward(params, user_ids, item_ids, user_features, item_features)
    out = jax.block_until_ready(out)

    ref = dcnv2_reference(raw, user_ids, item_ids, user_features, item_features)
    assert out.shape == (BATCH, 1)
    assert bool(jnp.all(jnp.isfinite(out)))
    assert float(jnp.max(jnp.abs(out - ref))) < 0.1   # bf16-weight tolerance
    print("KERNEL_OK")
</pallas_src>

<mosaic_0001>
module attributes {stable_mosaic.version = 11 : i64} {
  func.func @_dcnv2_kernel(%arg0: i32, %arg1: memref<8x6xi32, #tpu.memory_space<vmem>>, %arg2: memref<8x80xf32, #tpu.memory_space<vmem>>, %arg3: memref<150x80xbf16, #tpu.memory_space<vmem>>, %arg4: memref<80x80xbf16, #tpu.memory_space<vmem>>, %arg5: memref<1x80xf32, #tpu.memory_space<vmem>>, %arg6: memref<80x80xbf16, #tpu.memory_space<vmem>>, %arg7: memref<1x80xf32, #tpu.memory_space<vmem>>, %arg8: memref<80x32xbf16, #tpu.memory_space<vmem>>, %arg9: memref<1x32xf32, #tpu.memory_space<vmem>>, %arg10: memref<32x16xbf16, #tpu.memory_space<vmem>>, %arg11: memref<1x16xf32, #tpu.memory_space<vmem>>, %arg12: memref<1x80xf32, #tpu.memory_space<vmem>>, %arg13: memref<1x16xf32, #tpu.memory_space<vmem>>, %arg14: memref<8x1xf32, #tpu.memory_space<vmem>>) attributes {dimension_semantics = [#tpu.dimension_semantics<parallel>], iteration_bounds = array<i64: 1>, scalar_prefetch = 0 : i64, scratch_operands = 0 : i64, tpu.core_type = #tpu.core_type<tc>, window_params = [{transform_indices = @transform_0, window_bounds = array<i64: 8, 6>}, {transform_indices = @transform_1, window_bounds = array<i64: 8, 80>}, {pipeline_mode = #tpu.pipeline_mode<synchronous>, transform_indices = @transform_2, window_bounds = array<i64: 150, 80>}, {pipeline_mode = #tpu.pipeline_mode<synchronous>, transform_indices = @transform_3, window_bounds = array<i64: 80, 80>}, {pipeline_mode = #tpu.pipeline_mode<synchronous>, transform_indices = @transform_4, window_bounds = array<i64: 1, 80>}, {pipeline_mode = #tpu.pipeline_mode<synchronous>, transform_indices = @transform_5, window_bounds = array<i64: 80, 80>}, {pipeline_mode = #tpu.pipeline_mode<synchronous>, transform_indices = @transform_6, window_bounds = array<i64: 1, 80>}, {pipeline_mode = #tpu.pipeline_mode<synchronous>, transform_indices = @transform_7, window_bounds = array<i64: 80, 32>}, {pipeline_mode = #tpu.pipeline_mode<synchronous>, transform_indices = @transform_8, window_bounds = array<i64: 1, 32>}, {pipeline_mode = #tpu.pipeline_mode<synchronous>, transform_indices = @transform_9, window_bounds = array<i64: 32, 16>}, {pipeline_mode = #tpu.pipeline_mode<synchronous>, transform_indices = @transform_10, window_bounds = array<i64: 1, 16>}, {pipeline_mode = #tpu.pipeline_mode<synchronous>, transform_indices = @transform_11, window_bounds = array<i64: 1, 80>}, {pipeline_mode = #tpu.pipeline_mode<synchronous>, transform_indices = @transform_12, window_bounds = array<i64: 1, 16>}, {transform_indices = @transform_13, window_bounds = array<i64: 8, 1>}]} {
    %0 = tpu.iota {dimensions = array<i32: 1>} : vector<8x150xi32>
    %cst = arith.constant 0.000000e+00 : bf16
    %1 = vector.broadcast %cst : bf16 to vector<8x150xbf16>
    %c0 = arith.constant 0 : index
    %c0_0 = arith.constant 0 : index
    %2 = vector.load %arg1[%c0, %c0_0] : memref<8x6xi32, #tpu.memory_space<vmem>>, vector<8x1xi32>
    %3 = vector.broadcast %2 : vector<8x1xi32> to vector<8x150xi32>
    %4 = arith.cmpi eq, %0, %3 : vector<8x150xi32>
    %5 = arith.extui %4 : vector<8x150xi1> to vector<8x150xi32>
    %6 = arith.sitofp %5 : vector<8x150xi32> to vector<8x150xf32>
    %7 = arith.truncf %6 : vector<8x150xf32> to vector<8x150xbf16>
    %8 = arith.addf %1, %7 : vector<8x150xbf16>
    %c0_1 = arith.constant 0 : index
    %c1 = arith.constant 1 : index
    %9 = vector.load %arg1[%c0_1, %c1] : memref<8x6xi32, #tpu.memory_space<vmem>>, vector<8x1xi32>
    %10 = vector.broadcast %9 : vector<8x1xi32> to vector<8x150xi32>
    %11 = arith.cmpi eq, %0, %10 : vector<8x150xi32>
    %12 = arith.extui %11 : vector<8x150xi1> to vector<8x150xi32>
    %13 = arith.sitofp %12 : vector<8x150xi32> to vector<8x150xf32>
    %14 = arith.truncf %13 : vector<8x150xf32> to vector<8x150xbf16>
    %15 = arith.addf %8, %14 : vector<8x150xbf16>
    %c0_2 = arith.constant 0 : index
    %c2 = arith.constant 2 : index
    %16 = vector.load %arg1[%c0_2, %c2] : memref<8x6xi32, #tpu.memory_space<vmem>>, vector<8x1xi32>
    %17 = vector.broadcast %16 : vector<8x1xi32> to vector<8x150xi32>
    %18 = arith.cmpi eq, %0, %17 : vector<8x150xi32>
    %19 = arith.extui %18 : vector<8x150xi1> to vector<8x150xi32>
    %20 = arith.sitofp %19 : vector<8x150xi32> to vector<8x150xf32>
    %21 = arith.truncf %20 : vector<8x150xf32> to vector<8x150xbf16>
    %22 = arith.addf %15, %21 : vector<8x150xbf16>
    %c0_3 = arith.constant 0 : index
    %c3 = arith.constant 3 : index
    %23 = vector.load %arg1[%c0_3, %c3] : memref<8x6xi32, #tpu.memory_space<vmem>>, vector<8x1xi32>
    %24 = vector.broadcast %23 : vector<8x1xi32> to vector<8x150xi32>
    %25 = arith.cmpi eq, %0, %24 : vector<8x150xi32>
    %26 = arith.extui %25 : vector<8x150xi1> to vector<8x150xi32>
    %27 = arith.sitofp %26 : vector<8x150xi32> to vector<8x150xf32>
    %28 = arith.truncf %27 : vector<8x150xf32> to vector<8x150xbf16>
    %29 = arith.addf %22, %28 : vector<8x150xbf16>
    %c0_4 = arith.constant 0 : index
    %c4 = arith.constant 4 : index
    %30 = vector.load %arg1[%c0_4, %c4] : memref<8x6xi32, #tpu.memory_space<vmem>>, vector<8x1xi32>
    %31 = vector.broadcast %30 : vector<8x1xi32> to vector<8x150xi32>
    %32 = arith.cmpi eq, %0, %31 : vector<8x150xi32>
    %33 = arith.extui %32 : vector<8x150xi1> to vector<8x150xi32>
    %34 = arith.sitofp %33 : vector<8x150xi32> to vector<8x150xf32>
    %35 = arith.truncf %34 : vector<8x150xf32> to vector<8x150xbf16>
    %36 = arith.addf %29, %35 : vector<8x150xbf16>
    %c0_5 = arith.constant 0 : index
    %c5 = arith.constant 5 : index
    %37 = vector.load %arg1[%c0_5, %c5] : memref<8x6xi32, #tpu.memory_space<vmem>>, vector<8x1xi32>
    %38 = vector.broadcast %37 : vector<8x1xi32> to vector<8x150xi32>
    %39 = arith.cmpi eq, %0, %38 : vector<8x150xi32>
    %40 = arith.extui %39 : vector<8x150xi1> to vector<8x150xi32>
    %41 = arith.sitofp %40 : vector<8x150xi32> to vector<8x150xf32>
    %42 = arith.truncf %41 : vector<8x150xf32> to vector<8x150xbf16>
    %43 = arith.addf %36, %42 : vector<8x150xbf16>
    %c0_6 = arith.constant 0 : index
    %c0_7 = arith.constant 0 : index
    %44 = vector.load %arg3[%c0_6, %c0_7] : memref<150x80xbf16, #tpu.memory_space<vmem>>, vector<150x80xbf16>
    %cst_8 = arith.constant dense<0.000000e+00> : vector<8x80xf32>
    %45 = tpu.matmul %43, %44, %cst_8 {dimension_numbers = #tpu.dot_dimension_numbers<[1], [0], [0], [1], [0, 0, 1, 1], [], []>} : vector<8x150xbf16>, vector<150x80xbf16>, vector<8x80xf32> -> vector<8x80xf32>
    %c0_9 = arith.constant 0 : index
    %c0_10 = arith.constant 0 : index
    %46 = vector.load %arg2[%c0_9, %c0_10] : memref<8x80xf32, #tpu.memory_space<vmem>>, vector<8x80xf32>
    %47 = arith.addf %45, %46 : vector<8x80xf32>
    %48 = arith.truncf %47 : vector<8x80xf32> to vector<8x80xbf16>
    %49 = tpu.iota {dimensions = array<i32: 1>} : vector<8x80xi32>
    %c48_i32 = arith.constant 48 : i32
    %50 = vector.broadcast %c48_i32 : i32 to vector<8x80xi32>
    %51 = arith.cmpi slt, %49, %50 : vector<8x80xi32>
    %c0_11 = arith.constant 0 : index
    %c0_12 = arith.constant 0 : index
    %52 = vector.load %arg4[%c0_11, %c0_12] : memref<80x80xbf16, #tpu.memory_space<vmem>>, vector<80x80xbf16>
    %cst_13 = arith.constant dense<0.000000e+00> : vector<8x80xf32>
    %53 = tpu.matmul %48, %52, %cst_13 {dimension_numbers = #tpu.dot_dimension_numbers<[1], [0], [0], [1], [0, 0, 1, 1], [], []>} : vector<8x80xbf16>, vector<80x80xbf16>, vector<8x80xf32> -> vector<8x80xf32>
    %c0_14 = arith.constant 0 : index
    %c0_15 = arith.constant 0 : index
    %54 = vector.load %arg5[%c0_14, %c0_15] : memref<1x80xf32, #tpu.memory_space<vmem>>, vector<1x80xf32>
    %55 = vector.broadcast %54 : vector<1x80xf32> to vector<8x80xf32>
    %56 = arith.addf %53, %55 : vector<8x80xf32>
    %57 = arith.mulf %47, %56 : vector<8x80xf32>
    %58 = arith.addf %57, %47 : vector<8x80xf32>
    %cst_16 = arith.constant 0.000000e+00 : f32
    %59 = vector.broadcast %cst_16 : f32 to vector<8x80xf32>
    %60 = arith.maximumf %56, %59 : vector<8x80xf32>
    %61 = arith.select %51, %58, %60 : vector<8x80xi1>, vector<8x80xf32>
    %62 = arith.truncf %61 : vector<8x80xf32> to vector<8x80xbf16>
    %c0_17 = arith.constant 0 : index
    %c0_18 = arith.constant 0 : index
    %63 = vector.load %arg6[%c0_17, %c0_18] : memref<80x80xbf16, #tpu.memory_space<vmem>>, vector<80x80xbf16>
    %cst_19 = arith.constant dense<0.000000e+00> : vector<8x80xf32>
    %64 = tpu.matmul %62, %63, %cst_19 {dimension_numbers = #tpu.dot_dimension_numbers<[1], [0], [0], [1], [0, 0, 1, 1], [], []>} : vector<8x80xbf16>, vector<80x80xbf16>, vector<8x80xf32> -> vector<8x80xf32>
    %c0_20 = arith.constant 0 : index
    %c0_21 = arith.constant 0 : index
    %65 = vector.load %arg7[%c0_20, %c0_21] : memref<1x80xf32, #tpu.memory_space<vmem>>, vector<1x80xf32>
    %66 = vector.broadcast %65 : vector<1x80xf32> to vector<8x80xf32>
    %67 = arith.addf %64, %66 : vector<8x80xf32>
    %68 = arith.mulf %47, %67 : vector<8x80xf32>
    %69 = arith.addf %68, %58 : vector<8x80xf32>
    %cst_22 = arith.constant 0.000000e+00 : f32
    %70 = vector.broadcast %cst_22 : f32 to vector<8x80xf32>
    %71 = arith.maximumf %67, %70 : vector<8x80xf32>
    %72 = arith.truncf %71 : vector<8x80xf32> to vector<8x80xbf16>
    %c0_23 = arith.constant 0 : index
    %c0_24 = arith.constant 0 : index
    %73 = vector.load %arg8[%c0_23, %c0_24] : memref<80x32xbf16, #tpu.memory_space<vmem>>, vector<80x32xbf16>
    %cst_25 = arith.constant dense<0.000000e+00> : vector<8x32xf32>
    %74 = tpu.matmul %72, %73, %cst_25 {dimension_numbers = #tpu.dot_dimension_numbers<[1], [0], [0], [1], [0, 0, 1, 1], [], []>} : vector<8x80xbf16>, vector<80x32xbf16>, vector<8x32xf32> -> vector<8x32xf32>
    %c0_26 = arith.constant 0 : index
    %c0_27 = arith.constant 0 : index
    %75 = vector.load %arg9[%c0_26, %c0_27] : memref<1x32xf32, #tpu.memory_space<vmem>>, vector<1x32xf32>
    %76 = vector.broadcast %75 : vector<1x32xf32> to vector<8x32xf32>
    %77 = arith.addf %74, %76 : vector<8x32xf32>
    %cst_28 = arith.constant 0.000000e+00 : f32
    %78 = vector.broadcast %cst_28 : f32 to vector<8x32xf32>
    %79 = arith.maximumf %77, %78 : vector<8x32xf32>
    %80 = arith.truncf %79 : vector<8x32xf32> to vector<8x32xbf16>
    %c0_29 = arith.constant 0 : index
    %c0_30 = arith.constant 0 : index
    %81 = vector.load %arg10[%c0_29, %c0_30] : memref<32x16xbf16, #tpu.memory_space<vmem>>, vector<32x16xbf16>
    %cst_31 = arith.constant dense<0.000000e+00> : vector<8x16xf32>
    %82 = tpu.matmul %80, %81, %cst_31 {dimension_numbers = #tpu.dot_dimension_numbers<[1], [0], [0], [1], [0, 0, 1, 1], [], []>} : vector<8x32xbf16>, vector<32x16xbf16>, vector<8x16xf32> -> vector<8x16xf32>
    %c0_32 = arith.constant 0 : index
    %c0_33 = arith.constant 0 : index
    %83 = vector.load %arg11[%c0_32, %c0_33] : memref<1x16xf32, #tpu.memory_space<vmem>>, vector<1x16xf32>
    %84 = vector.broadcast %83 : vector<1x16xf32> to vector<8x16xf32>
    %85 = arith.addf %82, %84 : vector<8x16xf32>
    %c0_34 = arith.constant 0 : index
    %c0_35 = arith.constant 0 : index
    %86 = vector.load %arg12[%c0_34, %c0_35] : memref<1x80xf32, #tpu.memory_space<vmem>>, vector<1x80xf32>
    %87 = vector.broadcast %86 : vector<1x80xf32> to vector<8x80xf32>
    %88 = arith.mulf %69, %87 : vector<8x80xf32>
    %cst_36 = arith.constant dense<0.000000e+00> : vector<8xf32>
    %89 = vector.multi_reduction <add>, %88, %cst_36 [1] : vector<8x80xf32> to vector<8xf32>
    %90 = vector.shape_cast %89 : vector<8xf32> to vector<8x1xf32>
    %c0_37 = arith.constant 0 : index
    %c0_38 = arith.constant 0 : index
    %91 = vector.load %arg13[%c0_37, %c0_38] : memref<1x16xf32, #tpu.memory_space<vmem>>, vector<1x16xf32>
    %92 = vector.broadcast %91 : vector<1x16xf32> to vector<8x16xf32>
    %93 = arith.mulf %85, %92 : vector<8x16xf32>
    %cst_39 = arith.constant dense<0.000000e+00> : vector<8xf32>
    %94 = vector.multi_reduction <add>, %93, %cst_39 [1] : vector<8x16xf32> to vector<8xf32>
    %95 = vector.shape_cast %94 : vector<8xf32> to vector<8x1xf32>
    %96 = arith.addf %90, %95 : vector<8x1xf32>
    %97 = arith.negf %96 : vector<8x1xf32>
    %98 = math.exp %97 : vector<8x1xf32>
    %cst_40 = arith.constant 1.000000e+00 : f32
    %99 = vector.broadcast %cst_40 : f32 to vector<8x1xf32>
    %100 = arith.addf %99, %98 : vector<8x1xf32>
    %101 = arith.divf %99, %100 : vector<8x1xf32>
    %c0_41 = arith.constant 0 : index
    %c0_42 = arith.constant 0 : index
    %102 = vector.load %arg14[%c0_41, %c0_42] : memref<8x1xf32, #tpu.memory_space<vmem>>, vector<8x1xf32>
    tpu.vector_store %arg14[%c0_41, %c0_42], %101 {strides = array<i32>} : memref<8x1xf32, #tpu.memory_space<vmem>>, vector<8x1xf32>,
    return
  }
  func.func @transform_0(%arg0: i32) -> (i32, i32) {
    %c0_i32 = arith.constant 0 : i32
    %c0_i32_0 = arith.constant 0 : i32
    return %arg0, %c0_i32 : i32, i32
  }
  func.func @transform_1(%arg0: i32) -> (i32, i32) {
    %c0_i32 = arith.constant 0 : i32
    %c0_i32_0 = arith.constant 0 : i32
    return %arg0, %c0_i32 : i32, i32
  }
  func.func @transform_2(%arg0: i32) -> (i32, i32) {
    %c0_i32 = arith.constant 0 : i32
    %c0_i32_0 = arith.constant 0 : i32
    %c0_i32_1 = arith.constant 0 : i32
    return %c0_i32, %c0_i32_0 : i32, i32
  }
  func.func @transform_3(%arg0: i32) -> (i32, i32) {
    %c0_i32 = arith.constant 0 : i32
    %c0_i32_0 = arith.constant 0 : i32
    %c0_i32_1 = arith.constant 0 : i32
    return %c0_i32, %c0_i32_0 : i32, i32
  }
  func.func @transform_4(%arg0: i32) -> (i32, i32) {
    %c0_i32 = arith.constant 0 : i32
    %c0_i32_0 = arith.constant 0 : i32
    %c0_i32_1 = arith.constant 0 : i32
    return %c0_i32, %c0_i32_0 : i32, i32
  }
  func.func @transform_5(%arg0: i32) -> (i32, i32) {
    %c0_i32 = arith.constant 0 : i32
    %c0_i32_0 = arith.constant 0 : i32
    %c0_i32_1 = arith.constant 0 : i32
    return %c0_i32, %c0_i32_0 : i32, i32
  }
  func.func @transform_6(%arg0: i32) -> (i32, i32) {
    %c0_i32 = arith.constant 0 : i32
    %c0_i32_0 = arith.constant 0 : i32
    %c0_i32_1 = arith.constant 0 : i32
    return %c0_i32, %c0_i32_0 : i32, i32
  }
  func.func @transform_7(%arg0: i32) -> (i32, i32) {
    %c0_i32 = arith.constant 0 : i32
    %c0_i32_0 = arith.constant 0 : i32
    %c0_i32_1 = arith.constant 0 : i32
    return %c0_i32, %c0_i32_0 : i32, i32
  }
  func.func @transform_8(%arg0: i32) -> (i32, i32) {
    %c0_i32 = arith.constant 0 : i32
    %c0_i32_0 = arith.constant 0 : i32
    %c0_i32_1 = arith.constant 0 : i32
    return %c0_i32, %c0_i32_0 : i32, i32
  }
  func.func @transform_9(%arg0: i32) -> (i32, i32) {
    %c0_i32 = arith.constant 0 : i32
    %c0_i32_0 = arith.constant 0 : i32
    %c0_i32_1 = arith.constant 0 : i32
    return %c0_i32, %c0_i32_0 : i32, i32
  }
  func.func @transform_10(%arg0: i32) -> (i32, i32) {
    %c0_i32 = arith.constant 0 : i32
    %c0_i32_0 = arith.constant 0 : i32
    %c0_i32_1 = arith.constant 0 : i32
    return %c0_i32, %c0_i32_0 : i32, i32
  }
  func.func @transform_11(%arg0: i32) -> (i32, i32) {
    %c0_i32 = arith.constant 0 : i32
    %c0_i32_0 = arith.constant 0 : i32
    %c0_i32_1 = arith.constant 0 : i32
    return %c0_i32, %c0_i32_0 : i32, i32
  }
  func.func @transform_12(%arg0: i32) -> (i32, i32) {
    %c0_i32 = arith.constant 0 : i32
    %c0_i32_0 = arith.constant 0 : i32
    %c0_i32_1 = arith.constant 0 : i32
    return %c0_i32, %c0_i32_0 : i32, i32
  }
  func.func @transform_13(%arg0: i32) -> (i32, i32) {
    %c0_i32 = arith.constant 0 : i32
    %c0_i32_0 = arith.constant 0 : i32
    return %arg0, %c0_i32 : i32, i32
  }
}

</mosaic_0001>

<bundles_post_ra>
// kernel: dcnv2_forward.1
= control target key start
LH: loop header
LB: loop body
LE: loop exit
PB: predicated region body
PF: predicated region fallthrough
CT: control target
= control target key end

     0   :  { %18 = vsyncpa [#allocation3], 0  ;;  %s1231_s0 = inlined_call_operand.vmem [shape: s32[8,6], index: 0, kind: input, shape index: {}]   ;;  %s1232_s1 = inlined_call_operand.vmem [shape: f32[8,80], index: 1, kind: input, shape index: {}]   ;;  %s1233_s2 = inlined_call_operand.vmem [shape: bf16[150,80], index: 2, kind: input, shape index: {}]   ;;  %s1234_s3 = inlined_call_operand.vmem [shape: bf16[80,80], index: 3, kind: input, shape index: {}]   ;;  %s1235_s4 = inlined_call_operand.hbm [shape: f32[1,80], index: 4, kind: input, shape index: {}]   ;;  %s1236_s5 = inlined_call_operand.vmem [shape: bf16[80,80], index: 5, kind: input, shape index: {}]   ;;  %s1237_s6 = inlined_call_operand.hbm [shape: f32[1,80], index: 6, kind: input, shape index: {}]   ;;  %s1238_s7 = inlined_call_operand.vmem [shape: bf16[80,32], index: 7, kind: input, shape index: {}]   ;;  %s1239_s8 = inlined_call_operand.hbm [shape: f32[1,32], index: 8, kind: input, shape index: {}]   ;;  %s1240_s9 = inlined_call_operand.vmem [shape: bf16[32,16], index: 9, kind: input, shape index: {}]   ;;  %s1241_s10 = inlined_call_operand.hbm [shape: f32[1,16], index: 10, kind: input, shape index: {}]   ;;  %s1242_s11 = inlined_call_operand.vmem [shape: f32[1,80], index: 11, kind: input, shape index: {}]   ;;  %s1243_s12 = inlined_call_operand.vmem [shape: f32[1,16], index: 12, kind: input, shape index: {}]   ;;  %s1244_s13 = inlined_call_operand.vmem [shape: f32[8,1], index: 13, kind: output, shape index: {}]  }
   0x1   :  { %19 = vsyncpa [#allocation5], 0 }
   0x2   :  { %20 = vsyncpa [#allocation8], 0  ;;  %s954_s25 = smov [#allocation4]   ;;  %s955_s27 = smov [#allocation2]  }
   0x3   :  { %s47_s26 = sshll.u32 %s954_s25, 4  ;;  %s35_s28 = sshll.u32 %s955_s27, 4  ;;  %s48_s26 = int_to_ptr.vmem [resolvable:$true] %s47_s26  ;;  %s36_s28 = int_to_ptr.vmem [resolvable:$true] %s35_s28 }
   0x4   :  { %s860_s14 = scalar_lea.hbm %s1237_s6, 16 }
   0x5   :  { %p861_p0 = scmp.ne.s32.totalorder %s1237_s6, %s860_s14  ;;  %p864_p1 = scmp.lt.u32.totalorder %s860_s14, %s1237_s6 }
   0x7   :  { %p866_p2 = pnand %p864_p1, %p861_p0 }
   0x9   :  { %869 = shalt.err (!%p866_p2)
}
   0xa   :  { %s870_s19 = scalar_lea.vmem %s48_s26, 16  ;;  %s874_s20 = scalar_lea.vmem %s48_s26, 32 }
   0xb   :  { %p871_p3 = scmp.ne.s32.totalorder %s48_s26, %s870_s19  ;;  %p875_p4 = scmp.lt.s32.totalorder %s48_s26, %s48_s26 }
   0xc   :  { %p876_p5 = scmp.lt.s32.totalorder %s874_s20, %s870_s19 }
   0xe   :  { %p877_p6 = por %p876_p5, %p875_p4 }
  0x10   :  { %p878_p7 = pnand %p877_p6, %p871_p3 }
  0x12   :  { %881 = shalt.err (!%p878_p7)
}
  0x13   :  { %50 = dma.hbm_to_vmem [thread:$0]  %s1237_s6, 16, %s48_s26, [#allocation5]  }
  0x14   :  { %s882_s25 = scalar_lea.hbm %s1235_s4, 16 }
  0x15   :  { %p883_p8 = scmp.ne.s32.totalorder %s1235_s4, %s882_s25  ;;  %p886_p9 = scmp.lt.u32.totalorder %s882_s25, %s1235_s4 }
  0x17   :  { %p888_p10 = pnand %p886_p9, %p883_p8 }
  0x19   :  { %891 = shalt.err (!%p888_p10)
}
  0x1a   :  { %s892_s15 = scalar_lea.vmem %s36_s28, 16  ;;  %s896_s16 = scalar_lea.vmem %s36_s28, 32 }
  0x1b   :  { %p893_p11 = scmp.ne.s32.totalorder %s36_s28, %s892_s15  ;;  %p897_p12 = scmp.lt.s32.totalorder %s36_s28, %s36_s28 }
  0x1c   :  { %p898_p13 = scmp.lt.s32.totalorder %s896_s16, %s892_s15 }
  0x1e   :  { %p899_p0 = por %p898_p13, %p897_p12 }
  0x20   :  { %p900_p1 = pnand %p899_p0, %p893_p11 }
  0x22   :  { %903 = shalt.err (!%p900_p1)
}
  0x23   :  { %38 = dma.hbm_to_vmem [thread:$0]  %s1235_s4, 16, %s36_s28, [#allocation3]  }
  0x24   :  { %s956_s17 = smov [#allocation6]   ;;  %s957_s19 = smov [#allocation7]  }
  0x25   :  { %s59_s18 = sshll.u32 %s956_s17, 4  ;;  %s71_s20 = sshll.u32 %s957_s19, 4  ;;  %s60_s18 = int_to_ptr.vmem [resolvable:$true] %s59_s18  ;;  %s72_s20 = int_to_ptr.vmem [resolvable:$true] %s71_s20 }
  0x26   :  { %s904_s23 = scalar_lea.hbm %s1239_s8, 16 }
  0x27   :  { %p905_p2 = scmp.ne.s32.totalorder %s1239_s8, %s904_s23  ;;  %p908_p3 = scmp.lt.u32.totalorder %s904_s23, %s1239_s8 }
  0x29   :  { %p910_p4 = pnand %p908_p3, %p905_p2 }
  0x2b   :  { %913 = shalt.err (!%p910_p4)
}
  0x2c   :  { %s914_s4 = scalar_lea.vmem %s60_s18, 16  ;;  %s918_s28 = scalar_lea.vmem %s60_s18, 32 }
  0x2d   :  { %p915_p5 = scmp.ne.s32.totalorder %s60_s18, %s914_s4  ;;  %p919_p6 = scmp.lt.s32.totalorder %s60_s18, %s60_s18 }
  0x2e   :  { %p920_p7 = scmp.lt.s32.totalorder %s918_s28, %s914_s4 }
  0x30   :  { %p921_p8 = por %p920_p7, %p919_p6 }
  0x32   :  { %p922_p9 = pnand %p921_p8, %p915_p5 }
  0x34   :  { %925 = shalt.err (!%p922_p9)
}
  0x35   :  { %62 = dma.hbm_to_vmem [thread:$0]  %s1239_s8, 16, %s60_s18, [#allocation5]  }
  0x36   :  { %s926_s6 = scalar_lea.hbm %s1241_s10, 16 }
  0x37   :  { %p927_p10 = scmp.ne.s32.totalorder %s1241_s10, %s926_s6  ;;  %p930_p11 = scmp.lt.u32.totalorder %s926_s6, %s1241_s10 }
  0x39   :  { %p932_p12 = pnand %p930_p11, %p927_p10 }
  0x3b   :  { %935 = shalt.err (!%p932_p12)
}
  0x3c   :  { %s936_s22 = scalar_lea.vmem %s72_s20, 16  ;;  %s940_s23 = scalar_lea.vmem %s72_s20, 32 }
  0x3d   :  { %p937_p13 = scmp.ne.s32.totalorder %s72_s20, %s936_s22  ;;  %p941_p0 = scmp.lt.s32.totalorder %s72_s20, %s72_s20 }
  0x3e   :  { %p942_p1 = scmp.lt.s32.totalorder %s940_s23, %s936_s22 }
  0x40   :  { %p943_p2 = por %p942_p1, %p941_p0 }
  0x42   :  { %p944_p3 = pnand %p943_p2, %p937_p13 }
  0x44   :  { %947 = shalt.err (!%p944_p3)
}
  0x45   :  { %74 = dma.hbm_to_vmem [thread:$0]  %s1241_s10, 16, %s72_s20, [#allocation8]  }
  0x46   :  { %948 = dma.done.wait [#allocation3], 16  }
  0x47   :  { %949 = vsyncadd [#allocation3], 4294967280 }
  0x48   :  { %950 = dma.done.wait [#allocation5], 32  }
  0x49   :  { %951 = vsyncadd [#allocation5], 4294967264 }
  0x4a   :  { %952 = dma.done.wait [#allocation8], 16  }
  0x4b   :  { %953 = vsyncadd [#allocation8], 4294967280  ;;  %v958_v0 = vmov 0   ;;  %v959_v1 = vmov 2   ;;  %v960_v2 = vmov 0.0   ;;  %v95_v3 = vld [vmem:[%s1231_s0] sm:$0xff]  ;;  %v92_v23 = vlaneseq }
  0x4c   :  { %823 = vset.pattern.permute.xlu0 %v958_v0  ;;  %825 = vset.pattern.permute.xlu1 %v959_v1  ;;  %v829_v4 = vld [vmem:[%s1233_s2] sm:$0xff]   ;;  %v830_v5 = vld [vmem:[%s1233_s2 + $0x8] sm:$0xff]   ;;  %v961_v6 = vmov 1   ;;  %v962_v7 = vmov 3   ;;  %v831_v8 = vld [vmem:[%s1233_s2 + $0x10] sm:$0xff]   ;;  %v963_v9 = vmov 4  }
  0x4d   :  { %259 = vmatprep.subr.bf16.mxu0 %v958_v0  ;;  %761 = vmatprep.subr.bf16.mxu1 %v960_v2  ;;  %v964_v10 = vmov 5   ;;  %v832_v11 = vld [vmem:[%s1233_s2 + $0x18] sm:$0xff]   ;;  %v833_v12 = vld [vmem:[%s1233_s2 + $0x20] sm:$0xff]   ;;  %v834_v13 = vld [vmem:[%s1233_s2 + $0x28] sm:$0xff]   ;;  %vm255_vm0 = vcmask 1042432   ;;  %v1135_v24 = vand.u32 127, %v92_v23 }
  0x4e   :  { %97 = vperm.xlu0 %823, %v95_v3   ;;  %123 = vperm.xlu1 %825, %v95_v3   ;;  %v839_v14 = vld [vmem:[%s1234_s3] sm:$0xff]   ;;  %v840_v15 = vld [vmem:[%s1234_s3 + $0x8] sm:$0xff]   ;;  %v835_v16 = vld [vmem:[%s1233_s2 + $0x30] sm:$0xff]   ;;  %vm251_vm13 = vcmask 179200   ;;  %vm965_vm14 = vmmov 0   ;;  %vm348_vm15 = vcmask 654336  }
  0x4f   :  { %260 = vmatpush1.bf16.msra.mxu0 %v829_v4  ;;  %762 = vmatpush3.bf16.msra.mxu1 %v839_v14  ;;  %v841_v17 = vld [vmem:[%s1234_s3 + $0x10] sm:$0xff]   ;;  %v836_v18 = vld [vmem:[%s1233_s2 + $0x38] sm:$0xff]   ;;  %v837_v20 = vld [vmem:[%s1233_s2 + $0x40] sm:$0xff]   ;;  %v94_v25 = vadd.s32 128, %v1135_v24 }
  0x50   :  { %261 = vmatprep.subr.bf16.mxu0 %v958_v0  ;;  %763 = vmatprep.subr.bf16.mxu1 %v960_v2  ;;  %v842_v19 = vld [vmem:[%s1234_s3 + $0x18] sm:$0xff]   ;;  %v838_v21 = vld [vmem:[%s1233_s2 + $0x48] ss:$0 sps:$4 sm:$0x77]  }
  0x51   :  { %v257_v22 = vsel %vm255_vm0, %v838_v21, 0  ;;  %771 = vmatprep.mubr.msk.bf16.mxu1 %vm965_vm14, %v960_v2  ;;  %v845_v14 = vld [vmem:[%s1236_s5 + $0x8] sm:$0xff]   ;;  %v712_v21 = vld [vmem:[#allocation2] ss:$0 sm:$0xff]  ;;  %vm300_vm0 = vcmp.lt.s32.totalorder %v1135_v24, 48 }
  0x52   :  { %824 = vset.pattern.permute.xlu0 %v961_v6  ;;  %826 = vset.pattern.permute.xlu1 %v962_v7  ;;  %v193_v6 = vld [vmem:[%s1232_s1] sm:$0xff] }
  0x53   :  { %110 = vperm.xlu0 %824, %v95_v3   ;;  %136 = vperm.xlu1 %826, %v95_v3  }
  0x54   :  { %262 = vmatpush1.bf16.msra.mxu0 %v830_v5  ;;  %764 = vmatpush3.bf16.msra.mxu1 %v840_v15  ;;  %v843_v5 = vld [vmem:[%s1234_s3 + $0x20] sm:$0xff]   ;;  %v846_v15 = vld [vmem:[%s1236_s5 + $0x10] sm:$0xff]  }
  0x55   :  { %263 = vmatprep.subr.bf16.mxu0 %v958_v0  ;;  %765 = vmatprep.subr.bf16.mxu1 %v960_v2 }
  0x57   :  { %827 = vset.pattern.permute.xlu1 %v963_v9  ;;  %828 = vset.pattern.permute.xlu0 %v964_v10 }
  0x58   :  { %149 = vperm.xlu1 %827, %v95_v3   ;;  %162 = vperm.xlu0 %828, %v95_v3  }
  0x59   :  { %264 = vmatpush1.bf16.msra.mxu0 %v831_v8  ;;  %766 = vmatpush3.bf16.msra.mxu1 %v841_v17  ;;  %v848_v17 = vld [vmem:[%s1236_s5 + $0x20] sm:$0xff]  }
  0x5a   :  { %265 = vmatprep.subr.bf16.mxu0 %v958_v0  ;;  %767 = vmatprep.subr.bf16.mxu1 %v960_v2 }
  0x5d   :  { %266 = vmatpush1.bf16.msra.mxu0 %v832_v11  ;;  %768 = vmatpush3.bf16.msra.mxu1 %v842_v19  ;;  %v844_v11 = vld [vmem:[%s1236_s5] sm:$0xff]   ;;  %v850_v19 = vld [vmem:[%s1238_s7 + $0x8] sm:$0xff]  }
  0x5e   :  { %267 = vmatprep.subr.bf16.mxu0 %v958_v0  ;;  %769 = vmatprep.subr.bf16.mxu1 %v960_v2 }
  0x61   :  { %268 = vmatpush1.bf16.msra.mxu0 %v833_v12  ;;  %770 = vmatpush3.bf16.msra.mxu1 %v843_v5 }
  0x62   :  { %269 = vmatprep.subr.bf16.mxu0 %v958_v0  ;;  %775 = vmatprep.subr.bf16.mxu1 %v960_v2 }
  0x65   :  { %270 = vmatpush1.bf16.msra.mxu0 %v834_v13 }
  0x66   :  { %271 = vmatprep.subr.bf16.mxu0 %v958_v0 }
  0x69   :  { %272 = vmatpush1.bf16.msra.mxu0 %v835_v16  ;;  %v847_v16 = vld [vmem:[%s1236_s5 + $0x18] sm:$0xff]  }
  0x6a   :  { %273 = vmatprep.subr.bf16.mxu0 %v958_v0 }
  0x6d   :  { %274 = vmatpush1.bf16.msra.mxu0 %v836_v18  ;;  %v849_v18 = vld [vmem:[%s1238_s7] sm:$0xff]  }
  0x6e   :  { %275 = vmatprep.subr.bf16.mxu0 %v958_v0 }
  0x71   :  { %276 = vmatpush1.bf16.msra.mxu0 %v837_v20  ;;  %v851_v20 = vld [vmem:[%s1238_s7 + $0x10] sm:$0xff]  }
  0x72   :  { %277 = vmatprep.subr.bf16.mxu0 %v958_v0 }
  0x75   :  { %278 = vmatpush1.bf16.msra.mxu0 %v257_v22 }
  0x76   :  { %789 = vmatprep.subr.bf16.mxu0 %v960_v2 }
  0xcd   :  { %v98_v26 = vpop.permute.xlu0 %97  ;;  %v124_v27 = vpop.permute.xlu1 %123 }
  0xce   :  { %vm99_vm1 = vcmp.eq.s32.totalorder %v1135_v24, %v98_v26  ;;  %vm100_vm2 = vcmp.eq.s32.totalorder %v94_v25, %v98_v26  ;;  %vm125_vm3 = vcmp.eq.s32.totalorder %v1135_v24, %v124_v27  ;;  %vm126_vm4 = vcmp.eq.s32.totalorder %v94_v25, %v124_v27 }
  0xcf   :  { %v689_v28 = vsel %vm99_vm1, 1.0, %v960_v2  ;;  %v690_v29 = vsel %vm100_vm2, 1.0, %v960_v2  ;;  %v693_v32 = vsel %vm125_vm3, 1.0, %v960_v2  ;;  %v694_v33 = vsel %vm126_vm4, 1.0, %v960_v2 }
  0xd0   :  { %v105_v30 = vpack.c.bf16 %v689_v28, %v689_v28  ;;  %v106_v31 = vpack.c.bf16 %v690_v29, %v690_v29  ;;  %v131_v44 = vpack.c.bf16 %v693_v32, %v693_v32  ;;  %v132_v45 = vpack.c.bf16 %v694_v33, %v694_v33  ;;  %v852_v33 = vld [vmem:[%s1238_s7 + $0x18] sm:$0xff]  }
  0xd1   :  { %vm606_vm1 = vcmask 261120   ;;  %vm669_vm2 = vcmask 130048   ;;  %vm680_vm3 = vcmask 7168  }
  0xd2   :  { %v111_v34 = vpop.permute.xlu0 %110  ;;  %v137_v35 = vpop.permute.xlu1 %136  ;;  %v107_v40 = vadd.bf16 0, %v105_v30  ;;  %v108_v41 = vadd.bf16 0, %v106_v31 }
  0xd3   :  { %vm112_vm5 = vcmp.eq.s32.totalorder %v1135_v24, %v111_v34  ;;  %vm113_vm6 = vcmp.eq.s32.totalorder %v94_v25, %v111_v34  ;;  %vm138_vm7 = vcmp.eq.s32.totalorder %v1135_v24, %v137_v35  ;;  %vm139_vm8 = vcmp.eq.s32.totalorder %v94_v25, %v137_v35  ;;  %v719_v34 = vld [vmem:[#allocation4] ss:$0 sm:$0xff] }
  0xd4   :  { %v691_v36 = vsel %vm112_vm5, 1.0, %v960_v2  ;;  %v692_v37 = vsel %vm113_vm6, 1.0, %v960_v2  ;;  %v695_v38 = vsel %vm138_vm7, 1.0, %v960_v2  ;;  %v696_v39 = vsel %vm139_vm8, 1.0, %v960_v2 }
  0xd5   :  { %v118_v42 = vpack.c.bf16 %v691_v36, %v691_v36  ;;  %v119_v43 = vpack.c.bf16 %v692_v37, %v692_v37  ;;  %v144_v48 = vpack.c.bf16 %v695_v38, %v695_v38  ;;  %v145_v49 = vpack.c.bf16 %v696_v39, %v696_v39 }
  0xd7   :  { %v120_v46 = vadd.bf16 %v118_v42, %v107_v40  ;;  %v121_v47 = vadd.bf16 %v119_v43, %v108_v41  ;;  %v150_v50 = vpop.permute.xlu1 %149  ;;  %v163_v51 = vpop.permute.xlu0 %162  ;;  %v737_v42 = vld [vmem:[%s1242_s11] ss:$0 sm:$0xff] }
  0xd8   :  { %vm151_vm9 = vcmp.eq.s32.totalorder %v1135_v24, %v150_v50  ;;  %vm152_vm10 = vcmp.eq.s32.totalorder %v94_v25, %v150_v50  ;;  %vm164_vm11 = vcmp.eq.s32.totalorder %v1135_v24, %v163_v51  ;;  %vm165_vm12 = vcmp.eq.s32.totalorder %v94_v25, %v163_v51  ;;  %v853_v24 = vld [vmem:[%s1238_s7 + $0x20] sm:$0xff]  }
  0xd9   :  { %v133_v52 = vadd.bf16 %v131_v44, %v120_v46  ;;  %v134_v53 = vadd.bf16 %v132_v45, %v121_v47  ;;  %v697_v54 = vsel %vm151_vm9, 1.0, %v960_v2  ;;  %v698_v55 = vsel %vm152_vm10, 1.0, %v960_v2  ;;  %v854_v47 = vld [vmem:[%s1240_s9] sm:$0xff]  }
  0xda   :  { %v157_v56 = vpack.c.bf16 %v697_v54, %v697_v54  ;;  %v158_v57 = vpack.c.bf16 %v698_v55, %v698_v55  ;;  %v699_v58 = vsel %vm164_vm11, 1.0, %v960_v2  ;;  %v700_v59 = vsel %vm165_vm12, 1.0, %v960_v2 }
  0xdb   :  { %v146_v60 = vadd.bf16 %v144_v48, %v133_v52  ;;  %v147_v61 = vadd.bf16 %v145_v49, %v134_v53  ;;  %v170_v62 = vpack.c.bf16 %v699_v58, %v699_v58  ;;  %v171_v63 = vpack.c.bf16 %v700_v59, %v700_v59  ;;  %v855_v48 = vld [vmem:[%s1240_s9 + $0x8] sm:$0xff]   ;;  %v726_v49 = vld [vmem:[#allocation6] ss:$0 sm:$0xff] }
  0xdd   :  { %v159_v0 = vadd.bf16 %v157_v56, %v146_v60  ;;  %v160_v1 = vadd.bf16 %v158_v57, %v147_v61  ;;  %v733_v57 = vld [vmem:[#allocation7] ss:$0 sm:$0xff] }
  0xdf   :  { %v173_v3 = vadd.bf16 %v171_v63, %v160_v1  ;;  %v172_v4 = vadd.bf16 %v170_v62, %v159_v0 }
  0xe1   :  { %711 = vmatprep.mubr.msk.bf16.mxu0 %vm251_vm13, %v173_v3 }
  0xe2   :  { %292 = vmatmul.mubr.bf16.vlgmr.msra.gmra.mrb[0].mxu0 %v172_v4 }
  0xe3   :  { %799 = vmatprep.mubr.msk.bf16.mxu0 %vm965_vm14, %v960_v2  ;;  %790 = vmatpush3.bf16.msra.mxu0 %v849_v18 }
  0xe4   :  { %791 = vmatprep.subr.bf16.mxu0 %v960_v2 }
  0xe7   :  { %792 = vmatpush3.bf16.msra.mxu0 %v850_v19 }
  0xe8   :  { %793 = vmatprep.subr.bf16.mxu0 %v960_v2 }
  0xeb   :  { %794 = vmatpush3.bf16.msra.mxu0 %v851_v20 }
  0xec   :  { %795 = vmatprep.subr.bf16.mxu0 %v960_v2 }
  0xef   :  { %796 = vmatpush3.bf16.msra.mxu0 %v852_v33 }
  0xf0   :  { %797 = vmatprep.subr.bf16.mxu0 %v960_v2 }
  0xf3   :  { %798 = vmatpush3.bf16.msra.mxu0 %v853_v24 }
 0x1b5   :  { %v293_v7 = vpop.f32.mrb[0].mxu0 }
 0x1b6   :  { %v294_v8 = vadd.f32 %v293_v7, %v193_v6  ;;  %v295_v9 = vpop.f32.mrb[1].mxu0 }
 0x1b7   :  { %v296_v10 = vpop.f32.mrb[2].mxu0 }
 0x1b8   :  { %v297_v12 = vpop.f32.mrb[3].mxu0  ;;  %v299_v13 = vpack.c.bf16 %v294_v8, %v294_v8 }
 0x1ba   :  { %772 = vmatmul.mubr.msk.bf16.vlgmr.msra.gmra.mrb[0].mxu1 %vm348_vm15, %v299_v13 }
 0x1bb   :  { %776 = vmatpush3.bf16.msra.mxu1 %v844_v11  ;;  %785 = vmatprep.mubr.msk.bf16.mxu1 %vm965_vm14, %v960_v2 }
 0x1bc   :  { %777 = vmatprep.subr.bf16.mxu1 %v960_v2 }
 0x1bf   :  { %778 = vmatpush3.bf16.msra.mxu1 %v845_v14 }
 0x1c0   :  { %779 = vmatprep.subr.bf16.mxu1 %v960_v2 }
 0x1c3   :  { %780 = vmatpush3.bf16.msra.mxu1 %v846_v15 }
 0x1c4   :  { %781 = vmatprep.subr.bf16.mxu1 %v960_v2 }
 0x1c7   :  { %782 = vmatpush3.bf16.msra.mxu1 %v847_v16 }
 0x1c8   :  { %783 = vmatprep.subr.bf16.mxu1 %v960_v2 }
 0x1cb   :  { %784 = vmatpush3.bf16.msra.mxu1 %v848_v17 }
 0x1cc   :  { %803 = vmatprep.subr.bf16.mxu1 %v960_v2 }
 0x28d   :  { %v386_v22 = vpop.f32.mrb[0].mxu1 }
 0x28e   :  { %v387_v23 = vadd.f32 %v712_v21, %v386_v22  ;;  %v773_v25 = vpop.f32.mrb[1].mxu1 }
 0x28f   :  { %v389_v26 = vpop.f32.mrb[2].mxu1 }
 0x290   :  { %v392_v27 = vmul.f32 %v387_v23, %v294_v8  ;;  %v774_v28 = vpop.f32.mrb[3].mxu1  ;;  %v394_v30 = vmax.f32 %v387_v23, 0.0 }
 0x292   :  { %v393_v29 = vadd.f32 %v392_v27, %v294_v8 }
 0x294   :  { %v395_v31 = vsel %vm300_vm0, %v393_v29, %v394_v30 }
 0x295   :  { %v396_v32 = vpack.c.bf16 %v395_v31, %v395_v31 }
 0x297   :  { %786 = vmatmul.mubr.msk.bf16.vlgmr.msra.gmra.mrb[4].mxu1 %vm348_vm15, %v396_v32 }
 0x298   :  { %807 = vmatprep.mubr.msk.bf16.mxu1 %vm965_vm14, %v960_v2  ;;  %804 = vmatpush3.bf16.msra.mxu1 %v854_v47 }
 0x299   :  { %805 = vmatprep.subr.bf16.mxu1 %v960_v2  ;;  %v738_v2 = vld [vmem:[%s1243_s12] ss:$0 sm:$0xff] }
 0x29c   :  { %806 = vmatpush3.bf16.msra.mxu1 %v855_v48 }
 0x36a   :  { %v481_v35 = vpop.f32.mrb[4].mxu1 }
 0x36b   :  { %v482_v36 = vadd.f32 %v719_v34, %v481_v35  ;;  %v787_v37 = vpop.f32.mrb[5].mxu1 }
 0x36c   :  { %v484_v38 = vpop.f32.mrb[6].mxu1 }
 0x36d   :  { %v487_v39 = vmul.f32 %v482_v36, %v294_v8  ;;  %v489_v40 = vmax.f32 %v482_v36, 0.0  ;;  %v788_v41 = vpop.f32.mrb[7].mxu1 }
 0x36f   :  { %v490_v43 = vpack.c.bf16 %v489_v40, %v489_v40  ;;  %v488_v44 = vadd.f32 %v487_v39, %v393_v29 }
 0x371   :  { %800 = vmatmul.mubr.msk.bf16.vlgmr.msra.gmra.mrb[4].mxu0 %vm348_vm15, %v490_v43  ;;  %v657_v45 = vmul.f32 %v737_v42, %v488_v44 }
 0x373   :  { %v658_v46 = vsel %vm348_vm15, %v657_v45, 0.0 }
 0x374   :  { %659 = vadd.xlane.f32.xlu1 %v658_v46 }
 0x401   :  { %v660_v1 = vpop.xlane.xlu1 %659 }
 0x444   :  { %v575_v50 = vpop.f32.mrb[4].mxu0 }
 0x445   :  { %v576_v51 = vadd.f32 %v726_v49, %v575_v50  ;;  %v801_v52 = vpop.f32.mrb[5].mxu0 }
 0x446   :  { %v578_v53 = vpop.f32.mrb[6].mxu0 }
 0x447   :  { %v581_v54 = vmax.f32 %v576_v51, 0.0  ;;  %v802_v55 = vpop.f32.mrb[7].mxu0 }
 0x449   :  { %v582_v56 = vpack.c.bf16 %v581_v54, %v581_v54 }
 0x44b   :  { %808 = vmatmul.mubr.msk.bf16.vlgmr.msra.gmra.mrb[8].mxu1 %vm606_vm1, %v582_v56 }
 0x51e   :  { %v644_v58 = vpop.f32.mrb[8].mxu1 }
 0x51f   :  { %v645_v59 = vadd.f32 %v733_v57, %v644_v58  ;;  %v809_v60 = vpop.f32.mrb[9].mxu1 }
 0x520   :  { %v647_v61 = vpop.f32.mrb[10].mxu1 }
 0x521   :  { %v810_v62 = vpop.f32.mrb[11].mxu1  ;;  %v668_v63 = vmul.f32 %v738_v2, %v645_v59 }
 0x523   :  { %v670_v0 = vsel %vm669_vm2, %v668_v63, 0.0 }
 0x524   :  { %671 = vadd.xlane.f32.xlu0 %v670_v0 }
 0x5b1   :  { %v672_v3 = vpop.xlane.xlu0 %671 }
 0x5b2   :  { %v673_v4 = vadd.f32 %v672_v3, %v660_v1 }
 0x5b4   :  { %v739_v5 = vmul.f32 -1.442695, %v673_v4 }
 0x5b6   :  { %856 = vpow2.f32 %v739_v5 }
 0x5c0   :  { %v857_v6 = vpop.eup %856 }
 0x5c1   :  { %v677_v7 = vadd.f32 1.0, %v857_v6 }
 0x5c3   :  { %858 = vrcp.f32 %v677_v7 }
 0x5cd   :  { %v859_v8 = vpop.eup %858 }
 0x5ce   :  { %681 = vst.msk [vmem:[%s1244_s13] sm:$0xff] %vm680_vm3, %v859_v8 }
 0x5cf   :  { %686 = vsyncpa [#allocation3], 1 }
 0x5d0   :  { %687 = vsyncpa [#allocation5], 1 }
 0x5d1   :  { %688 = vsyncpa [#allocation8], 1 }

</bundles_post_ra>
